<compile_context>
chip_gen: v7x
topology: tpu7x:2x2x1
jax: 0.10.0
libtpu: 0.0.40
codegen_flags: <defaults>
</compile_context>

<pallas_src>
import functools
import math

import jax
import jax.numpy as jnp
from jax.experimental import pallas as pl
from jax.experimental.pallas import tpu as pltpu


# ----------------------------------------------------------------------------- #
# Pallas kernel: fused attention for one (batch, query-tile) grid point
# ----------------------------------------------------------------------------- #
def _fused_attention_kernel(q_ref, k_ref, v_ref,
                            wqkv_ref, bqkv_ref, wo_ref, bo_ref,
                            o_ref,
                            kp_ref, vp_ref,
                            *, num_heads, mxu_dtype):
    # q_ref    : (1, TQ, E)   query tile for this batch
    # k_ref    : (1, Nk, E)   full key sequence (DMA'd only when the batch changes)
    # v_ref    : (1, Nk, E)
    # wqkv_ref : (3, E, D)    packed [Wq*scale | Wk | Wv]
    # bqkv_ref : (3, 1, D)    packed [bq*scale | bk | bv]
    # wo_ref   : (D, E), bo_ref : (1, E)
    # o_ref    : (1, TQ, E)
    # kp_ref/vp_ref : (Nk, D) f32 VMEM scratch, projected K/V cached across q tiles
    i = pl.program_id(1)

    def mx(x):
        return x.astype(mxu_dtype)

    # Project K/V once per batch (q-tile axis is innermost + "arbitrary", so i==0
    # runs first for every batch; the scratch then stays resident for all tiles).
    @pl.when(i == 0)
    def _project_kv():
        kp_ref[...] = (jnp.dot(mx(k_ref[0]), mx(wqkv_ref[1]),
                               preferred_element_type=jnp.float32) + bqkv_ref[1])
        vp_ref[...] = (jnp.dot(mx(v_ref[0]), mx(wqkv_ref[2]),
                               preferred_element_type=jnp.float32) + bqkv_ref[2])

    # Full-width query projection for this tile (softmax scale pre-folded into Wq/bq).
    qp = (jnp.dot(mx(q_ref[0]), mx(wqkv_ref[0]),
                  preferred_element_type=jnp.float32) + bqkv_ref[0])       # (TQ, D)
    kp = kp_ref[...]                                                       # (Nk, D)
    vp = vp_ref[...]                                                       # (Nk, D)

    D = qp.shape[-1]
    ch = D // num_heads
    big = jnp.finfo(jnp.float32).max

    # Per-head attention (unrolled; static lane slices of the projected activations).
    o_heads = []
    for h in range(num_heads):
        sl = slice(h * ch, (h + 1) * ch)
        qh, kh, vh = qp[:, sl], kp[:, sl], vp[:, sl]
        # scores (already scaled): (TQ, Nk), contraction over c_per_head
        s = jax.lax.dot_general(mx(qh), mx(kh), (((1,), (1,)), ((), ())),
                                preferred_element_type=jnp.float32)
        # parity with the torch +/-inf clamp (no finite f32 exceeds finfo.max)
        s = jnp.clip(s, -big, big)
        # numerically-stable softmax, normalized AFTER the PV matmul
        p = jnp.exp(s - jnp.max(s, axis=-1, keepdims=True))
        row_sum = jnp.sum(p, axis=-1, keepdims=True)                       # (TQ, 1)
        oh = jnp.dot(mx(p), mx(vh), preferred_element_type=jnp.float32)    # (TQ, ch)
        o_heads.append(oh * pl.reciprocal(row_sum, approx=False))

    o_cat = jnp.concatenate(o_heads, axis=-1)                              # (TQ, D)

    # Single full-width output projection + bias.
    out = (jnp.dot(mx(o_cat), mx(wo_ref[...]),
                   preferred_element_type=jnp.float32) + bo_ref[...])
    o_ref[0] = out.astype(o_ref.dtype)


# ----------------------------------------------------------------------------- #
# Wrapper
# ----------------------------------------------------------------------------- #
def _pick_q_tile(nq, target=256):
    if nq <= target:
        return nq
    for t in range(target, 7, -1):
        if nq % t == 0 and t % 8 == 0:
            return t
    return nq  # fall back to a single full block


def attention_forward(q, k, v, params, num_heads, mxu_dtype=jnp.float32):
    """Pallas implementation of SAM's Attention.forward.

    q: (B, Nq, E)   k, v: (B, Nk, E)
    params: wq/wk/wv (E, D), bq/bk/bv (D,), wo (D, E), bo (E,), D = internal_dim.
    mxu_dtype: jnp.float32 for exact parity; jnp.bfloat16 for higher MXU throughput
               on v6e/v7x (f32 accumulation, f32 softmax; needs relaxed tolerance).
    """
    B, Nq, E = q.shape
    Nk = k.shape[1]
    wq, bq = params["wq"], params["bq"]
    wk, bk = params["wk"], params["bk"]
    wv, bv = params["wv"], params["bv"]
    wo, bo = params["wo"], params["bo"]
    D = wq.shape[1]
    assert D % num_heads == 0, "num_heads must divide internal_dim"
    ch = D // num_heads
    scale = 1.0 / math.sqrt(ch)

    # Wrapper-side layout plumbing (plain JAX, done once):
    #  * fold the softmax 1/sqrt(c_per_head) scale into Wq/bq,
    #  * pack q/k/v weights and biases so the kernel has fewer input blocks.
    w_qkv = jnp.stack([wq * scale, wk, wv]).astype(jnp.float32)            # (3, E, D)
    b_qkv = jnp.stack([(bq * scale).reshape(1, D),
                       bk.reshape(1, D),
                       bv.reshape(1, D)]).astype(jnp.float32)              # (3, 1, D)
    bo_2 = bo.reshape(1, E).astype(jnp.float32)

    tq = _pick_q_tile(Nq)
    n_q = Nq // tq
    grid = (B, n_q)

    # Rough VMEM budget (f32 bytes): double-buffered blocks + resident projected-K/V
    # scratch + in-kernel intermediates.  Used to raise the scoped-VMEM limit above
    # the per-generation default, capped below v7x's 64 MiB physical VMEM.
    est = 4 * (2 * tq * E            # q tile (double-buffered)
               + 2 * 2 * Nk * E      # k, v blocks
               + 2 * 3 * E * D       # packed qkv weights
               + 2 * D * E           # out-proj weight
               + 2 * tq * E          # output tile
               + 2 * Nk * D          # projected K/V scratch
               + num_heads * tq * Nk + 4 * tq * D + tq * E)
    vmem_limit = int(min(max(2 * est, 32 * 1024 * 1024), 60 * 1024 * 1024))

    kernel = functools.partial(_fused_attention_kernel,
                               num_heads=num_heads, mxu_dtype=mxu_dtype)

    return pl.pallas_call(
        kernel,
        out_shape=jax.ShapeDtypeStruct((B, Nq, E), jnp.float32),
        grid_spec=pltpu.PrefetchScalarGridSpec(
            num_scalar_prefetch=0,
            grid=grid,
            in_specs=[
                pl.BlockSpec((1, tq, E), lambda b, i: (b, i, 0)),   # q tile
                pl.BlockSpec((1, Nk, E), lambda b, i: (b, 0, 0)),   # k (fetched once per batch)
                pl.BlockSpec((1, Nk, E), lambda b, i: (b, 0, 0)),   # v
                pl.BlockSpec((3, E, D), lambda b, i: (0, 0, 0)),    # packed Wq|Wk|Wv
                pl.BlockSpec((3, 1, D), lambda b, i: (0, 0, 0)),    # packed bq|bk|bv
                pl.BlockSpec((D, E), lambda b, i: (0, 0)),          # Wo
                pl.BlockSpec((1, E), lambda b, i: (0, 0)),          # bo
            ],
            out_specs=pl.BlockSpec((1, tq, E), lambda b, i: (b, i, 0)),
            scratch_shapes=[pltpu.VMEM((Nk, D), jnp.float32),       # projected K cache
                            pltpu.VMEM((Nk, D), jnp.float32)],      # projected V cache
        ),
        # Batch axis is "parallel" (megacore shards it on v7x); the q-tile axis must be
        # "arbitrary" because the cached projected K/V creates a sequential dependence
        # on the i==0 step within each batch.
        compiler_params=pltpu.CompilerParams(
            dimension_semantics=("parallel", "arbitrary"),
            vmem_limit_bytes=vmem_limit),
    )(q, k, v, w_qkv, b_qkv, wo, bo_2)


# ----------------------------------------------------------------------------- #
# Pure-JAX reference (mirrors the PyTorch module) for correctness checking
# ----------------------------------------------------------------------------- #
def attention_ref(q, k, v, params, num_heads):
    qp = q @ params["wq"] + params["bq"]
    kp = k @ params["wk"] + params["bk"]
    vp = v @ params["wv"] + params["bv"]
    B, Nq, D = qp.shape
    Nk = kp.shape[1]
    ch = D // num_heads
    qh = qp.reshape(B, Nq, num_heads, ch).transpose(0, 2, 1, 3)
    kh = kp.reshape(B, Nk, num_heads, ch).transpose(0, 2, 1, 3)
    vh = vp.reshape(B, Nk, num_heads, ch).transpose(0, 2, 1, 3)
    attn = jnp.einsum("bhqc,bhkc->bhqk", qh, kh) / math.sqrt(ch)
    big = jnp.finfo(attn.dtype).max
    attn = jnp.where(attn == jnp.inf, big, attn)
    attn = jnp.where(attn == -jnp.inf, -big, attn)
    attn = jax.nn.softmax(attn, axis=-1)
    out = jnp.einsum("bhqk,bhkc->bhqc", attn, vh)
    out = out.transpose(0, 2, 1, 3).reshape(B, Nq, D)
    return out @ params["wo"] + params["bo"]


# ----------------------------------------------------------------------------- #
def init_params(key, E, D):
    ks = jax.random.split(key, 8)
    s = 0.05

    def n(kk, shape):
        return jax.random.normal(kk, shape, jnp.float32) * s

    return {
        "wq": n(ks[0], (E, D)), "bq": n(ks[1], (D,)),
        "wk": n(ks[2], (E, D)), "bk": n(ks[3], (D,)),
        "wv": n(ks[4], (E, D)), "bv": n(ks[5], (D,)),
        "wo": n(ks[6], (D, E)), "bo": n(ks[7], (E,)),
    }


if __name__ == "__main__":
    key = jax.random.PRNGKey(0)
    B, Nq, Nk = 2, 8, 16
    embedding_dim, num_heads, downsample_rate = 32, 2, 2
    internal_dim = embedding_dim // downsample_rate          # 16, c_per_head = 8

    kq, kk, kv, kp = jax.random.split(key, 4)
    q = jax.random.normal(kq, (B, Nq, embedding_dim), jnp.float32)
    k = jax.random.normal(kk, (B, Nk, embedding_dim), jnp.float32)
    v = jax.random.normal(kv, (B, Nk, embedding_dim), jnp.float32)
    params = init_params(kp, embedding_dim, internal_dim)

    ref = attention_ref(q, k, v, params, num_heads)

    # f32 MXU operands: exact parity with the torch module.
    fwd = jax.jit(attention_forward, static_argnames=("num_heads",))
    out = fwd(q, k, v, params, num_heads=num_heads)
    jax.block_until_ready(out)
    assert out.shape == (B, Nq, embedding_dim), out.shape
    assert jnp.all(jnp.isfinite(out))
    assert jnp.allclose(out, ref, atol=1e-4, rtol=1e-4), float(jnp.max(jnp.abs(out - ref)))

    # bf16 MXU operands (v6e/v7x fast path), f32 accumulation: relaxed tolerance.
    fwd_bf16 = jax.jit(functools.partial(attention_forward, mxu_dtype=jnp.bfloat16),
                       static_argnames=("num_heads",))
    out_bf16 = fwd_bf16(q, k, v, params, num_heads=num_heads)
    jax.block_until_ready(out_bf16)
    assert jnp.all(jnp.isfinite(out_bf16))
    assert jnp.allclose(out_bf16, ref, atol=3e-2, rtol=3e-2), \
        float(jnp.max(jnp.abs(out_bf16 - ref)))

    print("KERNEL_OK")
</pallas_src>

<mosaic_0001>
module attributes {stable_mosaic.version = 11 : i64} {
  func.func @_fused_attention_kernel(%arg0: i32, %arg1: i32, %arg2: memref<1x8x32xf32, #tpu.memory_space<vmem>>, %arg3: memref<1x16x32xf32, #tpu.memory_space<vmem>>, %arg4: memref<1x16x32xf32, #tpu.memory_space<vmem>>, %arg5: memref<3x32x16xf32, #tpu.memory_space<vmem>>, %arg6: memref<3x1x16xf32, #tpu.memory_space<vmem>>, %arg7: memref<16x32xf32, #tpu.memory_space<vmem>>, %arg8: memref<1x32xf32, #tpu.memory_space<vmem>>, %arg9: memref<1x8x32xf32, #tpu.memory_space<vmem>>, %arg10: memref<16x16xf32, #tpu.memory_space<vmem>>, %arg11: memref<16x16xf32, #tpu.memory_space<vmem>>) attributes {dimension_semantics = [#tpu.dimension_semantics<parallel>, #tpu.dimension_semantics<arbitrary>], iteration_bounds = array<i64: 2, 1>, scalar_prefetch = 0 : i64, scratch_operands = 2 : i64, tpu.core_type = #tpu.core_type<tc>, window_params = [{transform_indices = @transform_0, window_bounds = array<i64: 1, 8, 32>}, {transform_indices = @transform_1, window_bounds = array<i64: 1, 16, 32>}, {transform_indices = @transform_2, window_bounds = array<i64: 1, 16, 32>}, {pipeline_mode = #tpu.pipeline_mode<synchronous>, transform_indices = @transform_3, window_bounds = array<i64: 3, 32, 16>}, {pipeline_mode = #tpu.pipeline_mode<synchronous>, transform_indices = @transform_4, window_bounds = array<i64: 3, 1, 16>}, {pipeline_mode = #tpu.pipeline_mode<synchronous>, transform_indices = @transform_5, window_bounds = array<i64: 16, 32>}, {pipeline_mode = #tpu.pipeline_mode<synchronous>, transform_indices = @transform_6, window_bounds = array<i64: 1, 32>}, {transform_indices = @transform_7, window_bounds = array<i64: 1, 8, 32>}]} {
    %c0_i32 = arith.constant 0 : i32
    %0 = arith.cmpi eq, %arg1, %c0_i32 : i32
    %1 = arith.extui %0 : i1 to i32
    %c0_i32_0 = arith.constant 0 : i32
    %2 = arith.cmpi ne, %1, %c0_i32_0 : i32
    scf.if %2 {
      %c0_33 = arith.constant 0 : index
      %c0_34 = arith.constant 0 : index
      %c0_35 = arith.constant 0 : index
      %61 = vector.load %arg3[%c0_33, %c0_34, %c0_35] : memref<1x16x32xf32, #tpu.memory_space<vmem>>, vector<1x16x32xf32>
      %62 = vector.shape_cast %61 : vector<1x16x32xf32> to vector<16x32xf32>
      %c1 = arith.constant 1 : index
      %c0_36 = arith.constant 0 : index
      %c0_37 = arith.constant 0 : index
      %63 = vector.load %arg5[%c1, %c0_36, %c0_37] : memref<3x32x16xf32, #tpu.memory_space<vmem>>, vector<1x32x16xf32>
      %64 = vector.shape_cast %63 : vector<1x32x16xf32> to vector<32x16xf32>
      %cst_38 = arith.constant dense<0.000000e+00> : vector<16x16xf32>
      %65 = tpu.matmul %62, %64, %cst_38 {dimension_numbers = #tpu.dot_dimension_numbers<[1], [0], [0], [1], [0, 0, 1, 1], [], []>} : vector<16x32xf32>, vector<32x16xf32>, vector<16x16xf32> -> vector<16x16xf32>
      %c1_39 = arith.constant 1 : index
      %c0_40 = arith.constant 0 : index
      %c0_41 = arith.constant 0 : index
      %66 = vector.load %arg6[%c1_39, %c0_40, %c0_41] : memref<3x1x16xf32, #tpu.memory_space<vmem>>, vector<1x1x16xf32>
      %67 = vector.shape_cast %66 : vector<1x1x16xf32> to vector<1x16xf32>
      %68 = vector.broadcast %67 : vector<1x16xf32> to vector<16x16xf32>
      %69 = arith.addf %65, %68 : vector<16x16xf32>
      %c0_42 = arith.constant 0 : index
      %c0_43 = arith.constant 0 : index
      %70 = vector.load %arg10[%c0_42, %c0_43] : memref<16x16xf32, #tpu.memory_space<vmem>>, vector<16x16xf32>
      tpu.vector_store %arg10[%c0_42, %c0_43], %69 {strides = array<i32>} : memref<16x16xf32, #tpu.memory_space<vmem>>, vector<16x16xf32>,
      %c0_44 = arith.constant 0 : index
      %c0_45 = arith.constant 0 : index
      %c0_46 = arith.constant 0 : index
      %71 = vector.load %arg4[%c0_44, %c0_45, %c0_46] : memref<1x16x32xf32, #tpu.memory_space<vmem>>, vector<1x16x32xf32>
      %72 = vector.shape_cast %71 : vector<1x16x32xf32> to vector<16x32xf32>
      %c2 = arith.constant 2 : index
      %c0_47 = arith.constant 0 : index
      %c0_48 = arith.constant 0 : index
      %73 = vector.load %arg5[%c2, %c0_47, %c0_48] : memref<3x32x16xf32, #tpu.memory_space<vmem>>, vector<1x32x16xf32>
      %74 = vector.shape_cast %73 : vector<1x32x16xf32> to vector<32x16xf32>
      %cst_49 = arith.constant dense<0.000000e+00> : vector<16x16xf32>
      %75 = tpu.matmul %72, %74, %cst_49 {dimension_numbers = #tpu.dot_dimension_numbers<[1], [0], [0], [1], [0, 0, 1, 1], [], []>} : vector<16x32xf32>, vector<32x16xf32>, vector<16x16xf32> -> vector<16x16xf32>
      %c2_50 = arith.constant 2 : index
      %c0_51 = arith.constant 0 : index
      %c0_52 = arith.constant 0 : index
      %76 = vector.load %arg6[%c2_50, %c0_51, %c0_52] : memref<3x1x16xf32, #tpu.memory_space<vmem>>, vector<1x1x16xf32>
      %77 = vector.shape_cast %76 : vector<1x1x16xf32> to vector<1x16xf32>
      %78 = vector.broadcast %77 : vector<1x16xf32> to vector<16x16xf32>
      %79 = arith.addf %75, %78 : vector<16x16xf32>
      %c0_53 = arith.constant 0 : index
      %c0_54 = arith.constant 0 : index
      %80 = vector.load %arg11[%c0_53, %c0_54] : memref<16x16xf32, #tpu.memory_space<vmem>>, vector<16x16xf32>
      tpu.vector_store %arg11[%c0_53, %c0_54], %79 {strides = array<i32>} : memref<16x16xf32, #tpu.memory_space<vmem>>, vector<16x16xf32>,
    } else {
    }
    %c0 = arith.constant 0 : index
    %c0_1 = arith.constant 0 : index
    %c0_2 = arith.constant 0 : index
    %3 = vector.load %arg2[%c0, %c0_1, %c0_2] : memref<1x8x32xf32, #tpu.memory_space<vmem>>, vector<1x8x32xf32>
    %4 = vector.shape_cast %3 : vector<1x8x32xf32> to vector<8x32xf32>
    %c0_3 = arith.constant 0 : index
    %c0_4 = arith.constant 0 : index
    %c0_5 = arith.constant 0 : index
    %5 = vector.load %arg5[%c0_3, %c0_4, %c0_5] : memref<3x32x16xf32, #tpu.memory_space<vmem>>, vector<1x32x16xf32>
    %6 = vector.shape_cast %5 : vector<1x32x16xf32> to vector<32x16xf32>
    %cst = arith.constant dense<0.000000e+00> : vector<8x16xf32>
    %7 = tpu.matmul %4, %6, %cst {dimension_numbers = #tpu.dot_dimension_numbers<[1], [0], [0], [1], [0, 0, 1, 1], [], []>} : vector<8x32xf32>, vector<32x16xf32>, vector<8x16xf32> -> vector<8x16xf32>
    %c0_6 = arith.constant 0 : index
    %c0_7 = arith.constant 0 : index
    %c0_8 = arith.constant 0 : index
    %8 = vector.load %arg6[%c0_6, %c0_7, %c0_8] : memref<3x1x16xf32, #tpu.memory_space<vmem>>, vector<1x1x16xf32>
    %9 = vector.shape_cast %8 : vector<1x1x16xf32> to vector<1x16xf32>
    %10 = vector.broadcast %9 : vector<1x16xf32> to vector<8x16xf32>
    %11 = arith.addf %7, %10 : vector<8x16xf32>
    %c0_9 = arith.constant 0 : index
    %c0_10 = arith.constant 0 : index
    %12 = vector.load %arg10[%c0_9, %c0_10] : memref<16x16xf32, #tpu.memory_space<vmem>>, vector<16x16xf32>
    %c0_11 = arith.constant 0 : index
    %c0_12 = arith.constant 0 : index
    %13 = vector.load %arg11[%c0_11, %c0_12] : memref<16x16xf32, #tpu.memory_space<vmem>>, vector<16x16xf32>
    %14 = vector.extract_strided_slice %11 {offsets = [0, 0], sizes = [8, 8], strides = [1, 1]} : vector<8x16xf32> to vector<8x8xf32>
    %15 = vector.extract_strided_slice %12 {offsets = [0, 0], sizes = [16, 8], strides = [1, 1]} : vector<16x16xf32> to vector<16x8xf32>
    %16 = vector.extract_strided_slice %13 {offsets = [0, 0], sizes = [16, 8], strides = [1, 1]} : vector<16x16xf32> to vector<16x8xf32>
    %cst_13 = arith.constant dense<0.000000e+00> : vector<8x16xf32>
    %17 = tpu.matmul %14, %15, %cst_13 {dimension_numbers = #tpu.dot_dimension_numbers<[1], [1], [0], [0], [0, 0, 1, 0], [], []>} : vector<8x8xf32>, vector<16x8xf32>, vector<8x16xf32> -> vector<8x16xf32>
    %cst_14 = arith.constant -3.40282347E+38 : f32
    %cst_15 = arith.constant 3.40282347E+38 : f32
    %18 = vector.broadcast %cst_14 : f32 to vector<8x16xf32>
    %19 = arith.maximumf %18, %17 : vector<8x16xf32>
    %20 = vector.broadcast %cst_15 : f32 to vector<8x16xf32>
    %21 = arith.minimumf %20, %19 : vector<8x16xf32>
    %cst_16 = arith.constant dense<0xFF800000> : vector<8xf32>
    %22 = vector.multi_reduction <maximumf>, %21, %cst_16 [1] : vector<8x16xf32> to vector<8xf32>
    %23 = vector.shape_cast %22 : vector<8xf32> to vector<8x1xf32>
    %24 = vector.broadcast %23 : vector<8x1xf32> to vector<8x16xf32>
    %25 = arith.subf %21, %24 : vector<8x16xf32>
    %26 = math.exp %25 : vector<8x16xf32>
    %cst_17 = arith.constant dense<0.000000e+00> : vector<8xf32>
    %27 = vector.multi_reduction <add>, %26, %cst_17 [1] : vector<8x16xf32> to vector<8xf32>
    %28 = vector.shape_cast %27 : vector<8xf32> to vector<8x1xf32>
    %cst_18 = arith.constant dense<0.000000e+00> : vector<8x8xf32>
    %29 = tpu.matmul %26, %16, %cst_18 {dimension_numbers = #tpu.dot_dimension_numbers<[1], [0], [0], [1], [0, 0, 1, 1], [], []>} : vector<8x16xf32>, vector<16x8xf32>, vector<8x8xf32> -> vector<8x8xf32>
    %30 = tpu.reciprocal %28 : vector<8x1xf32> -> vector<8x1xf32>
    %31 = vector.broadcast %30 : vector<8x1xf32> to vector<8x8xf32>
    %32 = arith.mulf %29, %31 : vector<8x8xf32>
    %33 = vector.extract_strided_slice %11 {offsets = [0, 8], sizes = [8, 8], strides = [1, 1]} : vector<8x16xf32> to vector<8x8xf32>
    %34 = vector.extract_strided_slice %12 {offsets = [0, 8], sizes = [16, 8], strides = [1, 1]} : vector<16x16xf32> to vector<16x8xf32>
    %35 = vector.extract_strided_slice %13 {offsets = [0, 8], sizes = [16, 8], strides = [1, 1]} : vector<16x16xf32> to vector<16x8xf32>
    %cst_19 = arith.constant dense<0.000000e+00> : vector<8x16xf32>
    %36 = tpu.matmul %33, %34, %cst_19 {dimension_numbers = #tpu.dot_dimension_numbers<[1], [1], [0], [0], [0, 0, 1, 0], [], []>} : vector<8x8xf32>, vector<16x8xf32>, vector<8x16xf32> -> vector<8x16xf32>
    %cst_20 = arith.constant -3.40282347E+38 : f32
    %cst_21 = arith.constant 3.40282347E+38 : f32
    %37 = vector.broadcast %cst_20 : f32 to vector<8x16xf32>
    %38 = arith.maximumf %37, %36 : vector<8x16xf32>
    %39 = vector.broadcast %cst_21 : f32 to vector<8x16xf32>
    %40 = arith.minimumf %39, %38 : vector<8x16xf32>
    %cst_22 = arith.constant dense<0xFF800000> : vector<8xf32>
    %41 = vector.multi_reduction <maximumf>, %40, %cst_22 [1] : vector<8x16xf32> to vector<8xf32>
    %42 = vector.shape_cast %41 : vector<8xf32> to vector<8x1xf32>
    %43 = vector.broadcast %42 : vector<8x1xf32> to vector<8x16xf32>
    %44 = arith.subf %40, %43 : vector<8x16xf32>
    %45 = math.exp %44 : vector<8x16xf32>
    %cst_23 = arith.constant dense<0.000000e+00> : vector<8xf32>
    %46 = vector.multi_reduction <add>, %45, %cst_23 [1] : vector<8x16xf32> to vector<8xf32>
    %47 = vector.shape_cast %46 : vector<8xf32> to vector<8x1xf32>
    %cst_24 = arith.constant dense<0.000000e+00> : vector<8x8xf32>
    %48 = tpu.matmul %45, %35, %cst_24 {dimension_numbers = #tpu.dot_dimension_numbers<[1], [0], [0], [1], [0, 0, 1, 1], [], []>} : vector<8x16xf32>, vector<16x8xf32>, vector<8x8xf32> -> vector<8x8xf32>
    %49 = tpu.reciprocal %47 : vector<8x1xf32> -> vector<8x1xf32>
    %50 = vector.broadcast %49 : vector<8x1xf32> to vector<8x8xf32>
    %51 = arith.mulf %48, %50 : vector<8x8xf32>
    %52 = tpu.concatenate %32, %51 in 1 : vector<8x8xf32>, vector<8x8xf32> -> vector<8x16xf32>
    %c0_25 = arith.constant 0 : index
    %c0_26 = arith.constant 0 : index
    %53 = vector.load %arg7[%c0_25, %c0_26] : memref<16x32xf32, #tpu.memory_space<vmem>>, vector<16x32xf32>
    %cst_27 = arith.constant dense<0.000000e+00> : vector<8x32xf32>
    %54 = tpu.matmul %52, %53, %cst_27 {dimension_numbers = #tpu.dot_dimension_numbers<[1], [0], [0], [1], [0, 0, 1, 1], [], []>} : vector<8x16xf32>, vector<16x32xf32>, vector<8x32xf32> -> vector<8x32xf32>
    %c0_28 = arith.constant 0 : index
    %c0_29 = arith.constant 0 : index
    %55 = vector.load %arg8[%c0_28, %c0_29] : memref<1x32xf32, #tpu.memory_space<vmem>>, vector<1x32xf32>
    %56 = vector.broadcast %55 : vector<1x32xf32> to vector<8x32xf32>
    %57 = arith.addf %54, %56 : vector<8x32xf32>
    %c0_30 = arith.constant 0 : index
    %c0_31 = arith.constant 0 : index
    %c0_32 = arith.constant 0 : index
    %58 = vector.load %arg9[%c0_30, %c0_31, %c0_32] : memref<1x8x32xf32, #tpu.memory_space<vmem>>, vector<1x8x32xf32>
    %59 = vector.shape_cast %58 : vector<1x8x32xf32> to vector<8x32xf32>
    %60 = vector.shape_cast %57 : vector<8x32xf32> to vector<1x8x32xf32>
    tpu.vector_store %arg9[%c0_30, %c0_31, %c0_32], %60 {strides = array<i32>} : memref<1x8x32xf32, #tpu.memory_space<vmem>>, vector<1x8x32xf32>,
    return
  }
  func.func @transform_0(%arg0: i32, %arg1: i32) -> (i32, i32, i32) {
    %c0_i32 = arith.constant 0 : i32
    %c0_i32_0 = arith.constant 0 : i32
    return %arg0, %arg1, %c0_i32 : i32, i32, i32
  }
  func.func @transform_1(%arg0: i32, %arg1: i32) -> (i32, i32, i32) {
    %c0_i32 = arith.constant 0 : i32
    %c0_i32_0 = arith.constant 0 : i32
    %c0_i32_1 = arith.constant 0 : i32
    return %arg0, %c0_i32, %c0_i32_0 : i32, i32, i32
  }
  func.func @transform_2(%arg0: i32, %arg1: i32) -> (i32, i32, i32) {
    %c0_i32 = arith.constant 0 : i32
    %c0_i32_0 = arith.constant 0 : i32
    %c0_i32_1 = arith.constant 0 : i32
    return %arg0, %c0_i32, %c0_i32_0 : i32, i32, i32
  }
  func.func @transform_3(%arg0: i32, %arg1: i32) -> (i32, i32, i32) {
    %c0_i32 = arith.constant 0 : i32
    %c0_i32_0 = arith.constant 0 : i32
    %c0_i32_1 = arith.constant 0 : i32
    %c0_i32_2 = arith.constant 0 : i32
    return %c0_i32, %c0_i32_0, %c0_i32_1 : i32, i32, i32
  }
  func.func @transform_4(%arg0: i32, %arg1: i32) -> (i32, i32, i32) {
    %c0_i32 = arith.constant 0 : i32
    %c0_i32_0 = arith.constant 0 : i32
    %c0_i32_1 = arith.constant 0 : i32
    %c0_i32_2 = arith.constant 0 : i32
    return %c0_i32, %c0_i32_0, %c0_i32_1 : i32, i32, i32
  }
  func.func @transform_5(%arg0: i32, %arg1: i32) -> (i32, i32) {
    %c0_i32 = arith.constant 0 : i32
    %c0_i32_0 = arith.constant 0 : i32
    %c0_i32_1 = arith.constant 0 : i32
    return %c0_i32, %c0_i32_0 : i32, i32
  }
  func.func @transform_6(%arg0: i32, %arg1: i32) -> (i32, i32) {
    %c0_i32 = arith.constant 0 : i32
    %c0_i32_0 = arith.constant 0 : i32
    %c0_i32_1 = arith.constant 0 : i32
    return %c0_i32, %c0_i32_0 : i32, i32
  }
  func.func @transform_7(%arg0: i32, %arg1: i32) -> (i32, i32, i32) {
    %c0_i32 = arith.constant 0 : i32
    %c0_i32_0 = arith.constant 0 : i32
    return %arg0, %arg1, %c0_i32 : i32, i32, i32
  }
}

</mosaic_0001>

<bundles_post_ra>
// kernel: attention_forward.1
= control target key start
LH: loop header
LB: loop body
LE: loop exit
PB: predicated region body
PF: predicated region fallthrough
CT: control target
= control target key end

     0   :  { %12 = vsyncpa [#allocation5], 0  ;;  %s1791_s0 = inlined_call_operand.vmem [shape: f32[2,8,32], index: 0, kind: input, shape index: {}]   ;;  %s1792_s1 = inlined_call_operand.vmem [shape: f32[2,16,32], index: 1, kind: input, shape index: {}]   ;;  %s1793_s2 = inlined_call_operand.vmem [shape: f32[2,16,32], index: 2, kind: input, shape index: {}]   ;;  %s1794_s3 = inlined_call_operand.vmem [shape: f32[3,32,16], index: 3, kind: input, shape index: {}]   ;;  %s1795_s4 = inlined_call_operand.vmem [shape: f32[3,1,16], index: 4, kind: input, shape index: {}]   ;;  %s1796_s5 = inlined_call_operand.vmem [shape: f32[16,32], index: 5, kind: input, shape index: {}]   ;;  %s1797_s6 = inlined_call_operand.vmem [shape: f32[1,32], index: 6, kind: input, shape index: {}]   ;;  %s1798_s7 = inlined_call_operand.hbm [shape: f32[2,8,32], index: 7, kind: output, shape index: {}]  }
   0x1   :  { %14 = vsyncpa [#allocation5 + $0x1], 0  ;;  %s1562_s24 = smov 0   ;;  %s1564_s25 = smov 0  }
   0x2   :  { %s1566_s26 = smov 0   ;;  %s1568_s27 = smov 0  }
   0x3   :  { %s1570_s28 = smov 0   ;;  %s1572_s29 = smov 0  }
   0x4 LB: > { %s1172_s30 = sadd.s32 4294967295, %s1514_s29   ;;  %s1173_s8 = sadd.s32 4294967294, %s1514_s29   ;;  %s1514_s29 = sphi %s1572_s29, %s20_s29   ;;  %s1510_s28 = sphi %s1570_s28, %s1807_s28   ;;  %s1506_s27 = sphi %s1568_s27, %s1806_s27   ;;  %s1502_s26 = sphi %s1566_s26, %s1805_s26   ;;  %s1498_s25 = sphi %s1564_s25, %s1804_s25   ;;  %s1494_s24 = sphi %s1562_s24, %s1803_s24  }
   0x5   : > { %s32_s9 = sadd.s32 1, %s1510_s28  ;;  %s205_s10 = sadd.s32 1, %s1502_s26 }
   0x6   : > { %p34_p0 = scmp.ge.s32.totalorder %s32_s9, 2  ;;  %p215_p1 = scmp.ne.s32.totalorder %s1502_s26, %s1498_s25 }
   0x7   : > { %p216_p2 = scmp.eq.s32.totalorder %s1172_s30, 1  ;;  %p221_p3 = scmp.ne.s32.totalorder %s1498_s25, %s1494_s24 }
   0x8   : > { %s1809_s9 = smov (%p34_p0, %s32_s9), 0  ;;  %p222_p5 = scmp.eq.s32.totalorder %s1173_s8, 1 }
   0x9   : > { %p1602_p4 = por %p216_p2, %p215_p1  ;;  %s200_s12 = ssub.s32 %s1510_s28, %s1809_s9 }
   0xa   : > { %p1176_p6 = scmp.ge.s32.totalorder %s1514_s29, 1  ;;  %p203_p7 = scmp.eq.s32.totalorder %s200_s12, 0 }
   0xb   : > { %p1609_p8 = por %p222_p5, %p221_p3  ;;  %p278_p9 = scmp.lt.s32.totalorder %s1514_s29, 3 }
   0xc   : > { %s1615_s14 = scalar_select %p203_p7, %s1502_s26, %s205_s10  }
   0xd   : > { %p279_p10 = pnand %p1176_p6, %p278_p9 }
   0xe   : > { %v1183_v0 = vld [vmem:[%s1794_s3 + $0x20] sm:$0xff] (!%p279_p10)  ;;  %v1184_v1 = vld [vmem:[%s1794_s3 + $0x28] sm:$0xff] (!%p279_p10)  ;;  %v1185_v2 = vld [vmem:[%s1794_s3 + $0x30] sm:$0xff] (!%p279_p10)  ;;  %p322_p11 = scmp.lt.s32.totalorder (!%p279_p10), %s1506_s27, 1  ;;  %vm358_vm0 = vcmask (!%p279_p10), 261120   ;;  %v1516_v11 = vmov (!%p279_p10), 0.0|0.0  }
   0xf   : > { %282 = sbr.rel (%p279_p10) target bundleno = 1309 (0x51d), region = 48  ;;  %v1319_v3 = vpack.c.bf16 (!%p279_p10), %v1184_v1, %v1183_v0  ;;  %v1186_v4 = vld [vmem:[%s1794_s3 + $0x38] sm:$0xff] (!%p279_p10)  ;;  %v542_v6 = vld [vmem:[%s1794_s3] sm:$0xff] (!%p279_p10)  ;;  %v543_v7 = vld [vmem:[%s1794_s3 + $0x8] sm:$0xff] (!%p279_p10)  ;;  %vm1517_vm1 = vmmov (!%p279_p10), 0   ;;  %v1518_v15 = vmov (!%p279_p10), 0.0  }
  0x10   : > { %v1323_v5 = vpack.c.bf16 (!%p279_p10), %v1186_v4, %v1185_v2  ;;  %v1336_v10 = vpack.c.bf16 (!%p279_p10), %v543_v7, %v542_v6  ;;  %v544_v12 = vld [vmem:[%s1794_s3 + $0x10] sm:$0xff] (!%p279_p10)  ;;  %v545_v13 = vld [vmem:[%s1794_s3 + $0x18] sm:$0xff] (!%p279_p10)  ;;  %v1191_v17 = vld [vmem:[%s1794_s3 + $0x40] sm:$0xff] (!%p279_p10)  ;;  %vm440_vm2 = vcmask (!%p279_p10), 130048   ;;  %vm631_vm3 = vcmask (!%p279_p10), 64512   ;;  %s1519_s18 = smov (!%p279_p10), 120  }
  0x11   : > { %1320 = vmatprep.subr.bf16.mxu0 (!%p279_p10), %v1319_v3  ;;  %v1339_v14 = vpack.c.bf16 (!%p279_p10), %v545_v13, %v544_v12  ;;  %v1192_v18 = vld [vmem:[%s1794_s3 + $0x48] sm:$0xff] (!%p279_p10)  ;;  %v1193_v20 = vld [vmem:[%s1794_s3 + $0x50] sm:$0xff] (!%p279_p10)  ;;  %v1194_v21 = vld [vmem:[%s1794_s3 + $0x58] sm:$0xff] (!%p279_p10) }
  0x12   : > { %1322 = vmatpush3.bf16.msra.mxu0 (!%p279_p10), %v1319_v3  ;;  %v1327_v19 = vpack.c.bf16 (!%p279_p10), %v1192_v18, %v1191_v17  ;;  %v1331_v22 = vpack.c.bf16 (!%p279_p10), %v1194_v21, %v1193_v20  ;;  %v1188_v25 = vld [vmem:[%s1795_s4 + $0x1] ss:$0 sm:$0xff] (!%p279_p10)  ;;  %vm1694_vm4 = vmpackc.low (!%p279_p10), %vm631_vm3, %vm631_vm3  ;;  %v1199_v37 = vld [vmem:[%s1795_s4] ss:$0 sm:$0xff] (!%p279_p10) }
  0x13   : > { %1324 = vmatprep.subr.bf16.mxu0 (!%p279_p10), %v1323_v5  ;;  %v1196_v39 = vld [vmem:[%s1795_s4 + $0x2] ss:$0 sm:$0xff] (!%p279_p10) }
  0x14   : > { %1328 = vmatprep.subr.bf16.mxu1 (!%p279_p10), %v1327_v19  ;;  %v979_v12 = vld [vmem:[%s1796_s5] sm:$0xff] (!%p279_p10) }
  0x15   : > { %1330 = vmatpush3.bf16.msra.mxu1 (!%p279_p10), %v1327_v19 }
  0x16   : > { %s1631_s23 = scalar_select %p322_p11, %s1506_s27, 1  ;;  %1326 = vmatpush3.bf16.msra.mxu0 %v1323_v5  ;;  %1332 = vmatprep.subr.bf16.mxu1 %v1331_v22 }
  0x17   : > { %1335 = vmatprep.subr.bf16.mxu0 %v1516_v11 }
  0x18   : > { %s1217_s30 = sshll.u32 %s1631_s23, 4  ;;  %s1178_s8 = sshll.u32 %s1631_s23, 3 }
  0x19   : > { %s333_s12 = scalar_lea.vmem %s1792_s1, %s1217_s30  ;;  %s328_s15 = scalar_lea.vmem %s1791_s0, %s1178_s8  ;;  %1334 = vmatpush3.bf16.msra.mxu1 %v1331_v22 }
  0x1a   : > { %v343_v8 = vld [vmem:[%s333_s12] sm:$0xff]  ;;  %v344_v9 = vld [vmem:[%s333_s12 + $0x8] sm:$0xff]  ;;  %1341 = vmatprep.subr.bf16.mxu1 %v1516_v11  ;;  %s1520_s12 = smov 8  }
  0x1b   : > { %1259 = vmatprep.mubr.msk.f32.mxu0 %vm358_vm0, %v343_v8  ;;  %v541_v16 = vld [vmem:[%s328_s15] sm:$0xff]  ;;  %s338_s15 = scalar_lea.vmem %s1793_s2, %s1217_s30  ;;  %s1214_s30 = sshll.u32 %s1506_s27, 7 }
  0x1c   : > { %1260 = vmatmul.mubr.msk.f32.vlgmr.msra.gmra.mrb[0].mxu0 %vm358_vm0, %v344_v9  ;;  %v443_v23 = vld [vmem:[%s338_s15] sm:$0xff]  ;;  %v444_v24 = vld [vmem:[%s338_s15 + $0x8] sm:$0xff]  ;;  %s319_s15 = sand.u32 1, %s1498_s25   ;;  %s1743_s22 = scalar_lea.hbm %s1798_s7, %s1214_s30 }
  0x1d   : > { %1337 = vmatpush3.bf16.msra.mxu0 %v1336_v10  ;;  %1281 = vmatprep.mubr.msk.f32.mxu0 %vm1517_vm1, %v1518_v15  ;;  %s1177_s16 = sshll.u32 %s319_s15, 3  ;;  %s1063_s8 = scalar_lea.sflag [#allocation5], %s319_s15 }
  0x1e   : > { %1338 = vmatprep.subr.bf16.mxu0 %v1516_v11  ;;  %1270 = vmatprep.mubr.msk.f32.mxu1 %vm358_vm0, %v443_v23  ;;  %s1521_s27 = smov [#allocation4]  }
  0x1f   : > { %1271 = vmatmul.mubr.msk.f32.vlgmr.msra.gmra.mrb[0].mxu1 %vm358_vm0, %v444_v24 }
  0x20   : > { %1288 = vmatprep.mubr.msk.f32.mxu1 %vm1517_vm1, %v1518_v15 }
  0x21   : > { %1340 = vmatpush3.bf16.msra.mxu0 %v1339_v14 }
  0x22   : > { %1345 = vmatprep.subr.bf16.mxu0 %v1516_v11 }
  0x24   : > { %1282 = vmatmul.mubr.msk.f32.vlgmr.msra.gmra.mrb[2].mxu0 %vm358_vm0, %v541_v16 }
  0x25   : > { %1295 = vmatprep.mubr.msk.f32.mxu0 %vm1517_vm1, %v1518_v15 }
  0xef   : > { %v1261_v26 = vpop.f32.mrb[0].mxu0 }
  0xf0   : > { %v437_v27 = vadd.f32 %v1261_v26, %v1188_v25  ;;  %v431_v28 = vpop.f32.mrb[1].mxu0  ;;  %v1211_v26 = vld [vmem:[%s1797_s6] ss:$0 sm:$0xff] }
  0xf1   : > { %v432_v29 = vadd.f32 %v1188_v25, %v431_v28 }
  0xf2   : > { %442 = vst.msk [vmem:[#allocation2 + $0x8] sm:$0xff] %vm440_vm2, %v437_v27  ;;  %v1272_v40 = vpop.f32.mrb[0].mxu1 }
  0xf3   : > { %441 = vst.msk [vmem:[#allocation2] sm:$0xff] %vm440_vm2, %v432_v29  ;;  %v536_v41 = vadd.f32 %v1272_v40, %v1196_v39  ;;  %v530_v42 = vpop.f32.mrb[1].mxu1 }
  0xf4   : > { %v531_v43 = vadd.f32 %v1196_v39, %v530_v42 }
  0xf5   : > { %540 = vst.msk [vmem:[#allocation3 + $0x8] sm:$0xff] %vm440_vm2, %v536_v41 }
  0xf6   : > { %539 = vst.msk [vmem:[#allocation3] sm:$0xff] %vm440_vm2, %v531_v43 }
  0xf7   : > { %v623_v30 = vpop.f32.mrb[2].mxu0 }
  0xf8   : > { %v1283_v31 = vpop.f32.mrb[3].mxu0  ;;  %v624_v38 = vadd.f32 %v1199_v37, %v623_v30 }
  0xf9   : > { %v628_v32 = vld [vmem:[#allocation2 + $0x8] sm:$0xff] }
  0xfa   : > { %v627_v33 = vld [vmem:[#allocation2] sm:$0xff] }
  0xfb   : > { %v1418_v35 = vpack.i.bf16 %v628_v32, %v627_v33  ;;  %v1342_v36 = vpack.c.bf16 %v628_v32, %v627_v33 }
  0xfc   : > { %v630_v45 = vld [vmem:[#allocation3 + $0x8] sm:$0xff] }
  0xfd   : > { %1419 = vrot.lane.b32.xlu0 %v1418_v35, %s1519_s18  ;;  %1344 = vmatpush3.bf16.xpose.msk.msra.mxu1 %vm1694_vm4, %v1342_v36  ;;  %v629_v44 = vld [vmem:[#allocation3] sm:$0xff] }
  0xfe   : > { %1348 = vmatprep.subr.bf16.mxu1 %v1516_v11  ;;  %v1346_v46 = vpack.c.bf16 %v630_v45, %v629_v44  ;;  %v1423_v47 = vpack.i.bf16 %v630_v45, %v629_v44 }
 0x100   : > { %1347 = vmatpush3.bf16.msra.mxu0 %v1346_v46 }
 0x101   : > { %798 = vrot.lane.b32.xlu0 %v624_v38, %s1519_s18  ;;  %1352 = vmatprep.subr.bf16.mxu0 %v1516_v11 }
 0x104   : > { %1289 = vmatmul.mubr.msk.f32.vlgmr.msra.gmra.mrb[2].mxu1 %vm631_vm3, %v624_v38 }
 0x105   : > { %1302 = vmatprep.mubr.msk.f32.mxu1 %vm1517_vm1, %v1518_v15  ;;  %1424 = vrot.lane.b32.xlu0 %v1423_v47, %s1519_s18  ;;  %s321_s18 = scalar_lea.vmem [#allocation4], %s1177_s16 }
 0x106   : > { %s1077_s19 = sshll.u32 %s321_s18, 4  ;;  %s1745_s19 = int_to_ptr.vmem [resolvable:$true] %s1077_s19 }
 0x107   : > { %s1436_s10 = scalar_lea.vmem %s1745_s19, 128 }
 0x108   : > { %p1437_p12 = scmp.ne.s32.totalorder %s1745_s19, %s1436_s10 }
 0x10a   : > { %p1438_p13 = pnand %p1437_p12, %p1602_p4 }
 0x10c   : > { %p1439_p0 = pneg %p1438_p13 }
 0x16f   : > { %v1420_v48 = vpop.permute.xlu0 %1419 }
 0x170   : > { %v1422_v49 = vunpack.i.h.bf16 %v1420_v48  ;;  %v1421_v50 = vunpack.i.l.bf16 %v1420_v48 }
 0x172   : > { %v1349_v51 = vpack.c.bf16 %v1422_v49, %v1421_v50 }
 0x173   : > { %v799_v52 = vpop.permute.xlu0 %798 }
 0x174   : > { %1351 = vmatpush3.bf16.xpose.msk.msra.mxu1 %vm1694_vm4, %v1349_v51 }
 0x177   : > { %v1425_v0 = vpop.permute.xlu0 %1424 }
 0x178   : > { %v1427_v1 = vunpack.i.h.bf16 %v1425_v0  ;;  %v1426_v2 = vunpack.i.l.bf16 %v1425_v0 }
 0x17a   : > { %v1353_v3 = vpack.c.bf16 %v1427_v1, %v1426_v2 }
 0x17b   : > { %1303 = vmatmul.mubr.msk.f32.vlgmr.msra.gmra.mrb[4].mxu1 %vm631_vm3, %v799_v52 }
 0x1d7   : > { %v707_v53 = vpop.f32.mrb[2].mxu1 }
 0x1d8   : > { %v1204_v54 = vclamps-f32 %v707_v53, 3.4028235e+38  ;;  %v1290_v55 = vpop.f32.mrb[3].mxu1 }
 0x1da   : > { %v714_v56 = vsel %vm440_vm2, %v1204_v54, -inf }
 0x1db   : > { %715 = vmax.xlane.f32.xlu1 %v714_v56 }
 0x24e   : > { %v876_v57 = vpop.f32.mrb[4].mxu1 }
 0x24f   : > { %v1209_v58 = vclamps-f32 %v876_v57, 3.4028235e+38  ;;  %v1304_v59 = vpop.f32.mrb[5].mxu1 }
 0x251   : > { %v882_v60 = vsel %vm440_vm2, %v1209_v58, -inf }
 0x252   : > { %883 = vmax.xlane.f32.xlu1 %v882_v60 }
 0x268   : > { %v716_v61 = vpop.xlane.xlu1 %715 }
 0x269   : > { %v717_v62 = vsub.f32 %v1204_v54, %v716_v61 }
 0x26b   : > { %v718_v63 = vmul.f32 1.442695, %v717_v62 }
 0x26d   : > { %1428 = vpow2.f32 %v718_v63 }
 0x277   : > { %v1429_v4 = vpop.eup %1428 }
 0x278   : > { %1296 = vmatmul.mubr.msk.f32.vlgmr.msra.gmra.mrb[4].mxu0 %vm440_vm2, %v1429_v4  ;;  %v720_v5 = vsel %vm440_vm2, %v1429_v4, 0.0 }
 0x279   : > { %721 = vadd.xlane.f32.xlu0 %v720_v5  ;;  %1354 = vmatpush3.bf16.msra.mxu0 %v1353_v3 }
 0x27a   : > { %1309 = vmatprep.mubr.msk.f32.mxu0 %vm1517_vm1, %v1518_v15  ;;  %1355 = vmatprep.subr.bf16.mxu0 %v1516_v11  ;;  %v980_v11 = vld [vmem:[%s1796_s5 + $0x8] sm:$0xff] }
 0x27b   : > { %v1356_v13 = vpack.c.bf16 %v980_v11, %v979_v12 }
 0x2df   : > { %v884_v6 = vpop.xlane.xlu1 %883 }
 0x2e0   : > { %v885_v7 = vsub.f32 %v1209_v58, %v884_v6 }
 0x2e2   : > { %v886_v8 = vmul.f32 1.442695, %v885_v7 }
 0x2e4   : > { %1430 = vpow2.f32 %v886_v8 }
 0x2ee   : > { %v1431_v9 = vpop.eup %1430 }
 0x2ef   : > { %1310 = vmatmul.mubr.msk.f32.vlgmr.msra.gmra.mrb[6].mxu0 %vm440_vm2, %v1431_v9  ;;  %v888_v10 = vsel %vm440_vm2, %v1431_v9, 0.0 }
 0x2f0   : > { %889 = vadd.xlane.f32.xlu1 %v888_v10  ;;  %1316 = vmatprep.mubr.msk.f32.mxu0 %vm1517_vm1, %v1518_v15 }
 0x2f1   : > { %1357 = vmatpush3.bf16.msra.mxu0 %v1356_v13 }
 0x306   : > { %v722_v21 = vpop.xlane.xlu0 %721 }
 0x34b   : > { %v792_v14 = vpop.f32.mrb[4].mxu0 }
 0x34c   : > { %v1297_v16 = vpop.f32.mrb[5].mxu0 }
 0x37d   : > { %v890_v17 = vpop.xlane.xlu1 %889 }
 0x37e   : > { %1432 = vrcp.f32 %v890_v17 }
 0x37f   : > { %1434 = vrcp.f32 %v722_v21 }
 0x388   : > { %v1433_v18 = vpop.eup %1432 }
 0x389   : > { %v1435_v22 = vpop.eup %1434 }
 0x38a   : > { %v797_v23 = vmul.f32 %v1435_v22, %v792_v14 }
 0x3c2   : > { %v968_v19 = vpop.f32.mrb[6].mxu0 }
 0x3c3   : > { %v973_v20 = vmul.f32 %v1433_v18, %v968_v19  ;;  %v1311_v15 = vpop.f32.mrb[7].mxu0 }
 0x3c5   : > { %975 = vrot.lane.b32.xlu1 %v973_v20, %s1520_s12  ;;  %s1440_s12 = sshll.u32 %s1521_s27, 4  ;;  %s1441_s12 = int_to_ptr.vmem [resolvable:$false] %s1440_s12 }
 0x3c6   : > { %s1442_s16 = scalar_lea.vmem %s1441_s12, 256  ;;  %p1443_p1 = scmp.lt.s32.totalorder %s1745_s19, %s1441_s12 }
 0x3c7   : > { %p1444_p2 = scmp.lt.s32.totalorder %s1442_s16, %s1436_s10 }
 0x3c9   : > { %p1445_p3 = por %p1444_p2, %p1443_p1 }
 0x3cb   : > { %p1446_p5 = pnand %p1445_p3, %p1439_p0 }
 0x437   : > { %v976_v24 = vpop.permute.xlu1 %975 }
 0x438   : > { %v978_v25 = vsel %vm631_vm3, %v797_v23, %v976_v24 }
 0x439   : > { %1317 = vmatmul.mubr.msk.f32.vlgmr.msra.gmra.mrb[8].mxu0 %vm440_vm2, %v978_v25 }
 0x50c   : > { %v1057_v27 = vpop.f32.mrb[8].mxu0 }
 0x50d   : > { %v1058_v28 = vadd.f32 %v1211_v26, %v1057_v27  ;;  %v1318_v29 = vpop.f32.mrb[9].mxu0 }
 0x50f   : > { %1061 = vst.msk [vmem:[%s321_s18] sm:$0xff] %vm358_vm0, %v1058_v28 }
 0x510   : > { %1449 = shalt.err (!%p1446_p5)
}
 0x511   : > { %s1450_s15 = scalar_lea.hbm %s1743_s22, 128  ;;  %s1454_s30 = scalar_lea.hbm %s1798_s7, 256 }
 0x512   : > { %p1451_p6 = scmp.ne.s32.totalorder %s1743_s22, %s1450_s15  ;;  %p1455_p10 = scmp.lt.u32.totalorder %s1743_s22, %s1798_s7 }
 0x513   : > { %p1456_p11 = scmp.lt.u32.totalorder %s1454_s30, %s1450_s15  ;;  %p1458_p13 = scmp.lt.u32.totalorder %s1450_s15, %s1743_s22 }
 0x514   : > { %p1452_p7 = pnand %p1451_p6, %p1602_p4 }
 0x515   : > { %p1457_p12 = por %p1456_p11, %p1455_p10 }
 0x516   : > { %p1453_p9 = pneg %p1452_p7 }
 0x517   : > { %p1459_p0 = por %p1458_p13, %p1457_p12 }
 0x519   : > { %p1460_p1 = pnand %p1459_p0, %p1453_p9 }
 0x51b   : > { %1463 = shalt.err (!%p1460_p1)
}
 0x51c   : > { %1358 = dma.vmem_to_hbm [thread:$0]  (%p1602_p4), %s1745_s19, 128, %s1743_s22, %s1063_s8  }
 0x51d PF: > { %p1364_p2 = scmp.ge.s32.totalorder %s1514_s29, 2  ;;  %s1089_s21 = sand.u32 1, %s1494_s24  }
 0x51e   : > { %s1090_s10 = scalar_lea.sflag [#allocation5], %s1089_s21 }
 0x51f   : > { %p1361_p3 = pnand %p1364_p2, %p1609_p8 }
 0x521   : > { %1489 = dma.done.wait (!%p1361_p3), %s1090_s10, 128  }
 0x522   : > { %1491 = vsyncadd (!%p1361_p3), %s1090_s10, 4294967168  ;;  %s20_s29 = sadd.s32 1, %s1514_s29   ;;  %s1803_s24 = smov %s1498_s25 }
 0x523   : > { %p17_p5 = scmp.ge.s32.totalorder %s20_s29, 4   ;;  %s1804_s25 = smov %s1502_s26 }
 0x524   : > { %s1805_s26 = smov %s1615_s14  ;;  %s1806_s27 = smov %s1510_s28 }
 0x525   : > { %s1807_s28 = smov %s1809_s9  ;;  %19 = sbr.rel (!%p17_p5) target bundleno = 4 (0x4), region = 97 }
 0x52c   :  { %1095 = vsyncpa [#allocation5], 1 }
 0x52d   :  { %1097 = vsyncpa [#allocation5 + $0x1], 1 }

</bundles_post_ra>
